<compile_context>
chip_gen: v7x
topology: tpu7x:2x2x1
jax: 0.10.0
libtpu: 0.0.40
codegen_flags: <defaults>
</compile_context>

<pallas_src>
import functools

import jax
import jax.numpy as jnp
from jax.experimental import pallas as pl
from jax.experimental.pallas import tpu as pltpu


def _round_up(x, m):
    return ((x + m - 1) // m) * m


def _cdiv(a, b):
    return -(-a // b)


def _pick_tile(hw, c1, c2, n, tile_cap, vmem_budget_bytes):
    """Pixel tile: multiple of 128, sized so the double-buffered activation
    working set (x1 + x2 + out) stays within the VMEM budget."""
    bytes_per_col = (2 * c1 + c2) * 4          # x1 in + x2 in + out, f32
    t = vmem_budget_bytes // (2 * bytes_per_col)   # /2 for double buffering
    t = max(128, (t // 128) * 128)
    t = min(t, tile_cap, _round_up(hw, 128))
    # Keep >= 2 total grid steps so v7x (2 TCs/chip) has work for both cores.
    while n * _cdiv(hw, t) < 2 and t > 128:
        t = max(128, _round_up(t // 2, 128))
    return t


def _enhance_kernel(x1_ref, x2_ref,
                    wf1_ref, wf2_ref, bf_ref,
                    wg1a_ref, wg1b_ref, bg1_ref,
                    wg2_ref, bg2_ref,
                    o_ref):
    x1 = x1_ref[...].astype(jnp.float32)       # (C1, T)
    x2 = x2_ref[...].astype(jnp.float32)       # (C2, T)

    # FeatureFusion: conv1x1 over cat(x1, x2), split at C1.
    fused = (jnp.dot(wf1_ref[...], x1, preferred_element_type=jnp.float32)
             + jnp.dot(wf2_ref[...], x2, preferred_element_type=jnp.float32)
             + bf_ref[...])                    # (C1, T)

    # GatingMechanism: conv1x1 -> ReLU -> conv1x1 -> sigmoid.
    h = jnp.maximum(
        jnp.dot(wg1a_ref[...], x1, preferred_element_type=jnp.float32)
        + jnp.dot(wg1b_ref[...], x2, preferred_element_type=jnp.float32)
        + bg1_ref[...], 0.0)                   # (C1, T)
    g = jax.nn.sigmoid(
        jnp.dot(wg2_ref[...], h, preferred_element_type=jnp.float32)
        + bg2_ref[...])                        # (C1, T)

    # enhanced = g * fused + (1 - g) * x1 == x1 + g * (fused - x1)
    o_ref[...] = (x1 + g * (fused - x1)).astype(o_ref.dtype)


@functools.partial(jax.jit, static_argnames=("tile_cap", "vmem_budget_bytes"))
def feature_enhancement(x1, x2, params, tile_cap=131072,
                        vmem_budget_bytes=16 << 20):
    """x1: (N, C1, H, W), x2: (N, C2, H, W) NCHW float32. Returns (N, C1, H, W)."""
    N, C1, H, W = x1.shape
    C2 = x2.shape[1]
    HW = H * W

    tile = _pick_tile(HW, C1, C2, N, int(tile_cap), int(vmem_budget_bytes))
    n_pix_tiles = _cdiv(HW, tile)

    x1r = x1.reshape(N, C1, HW)
    x2r = x2.reshape(N, C2, HW)

    # PyTorch conv weights (Cout, Cin, 1, 1) -> (Cout, Cin), split at C1.
    wf = params["w_fuse"].reshape(C1, C1 + C2)
    wg1 = params["w_gate1"].reshape(C1, C1 + C2)
    wf1, wf2 = wf[:, :C1], wf[:, C1:]
    wg1a, wg1b = wg1[:, :C1], wg1[:, C1:]
    bf = params["b_fuse"].reshape(C1, 1)
    bg1 = params["b_gate1"].reshape(C1, 1)
    wg2 = params["w_gate2"].reshape(C1, C1)
    bg2 = params["b_gate2"].reshape(C1, 1)

    x1_spec = pl.BlockSpec((None, C1, tile), lambda n, p: (n, 0, p))
    x2_spec = pl.BlockSpec((None, C2, tile), lambda n, p: (n, 0, p))
    out_spec = pl.BlockSpec((None, C1, tile), lambda n, p: (n, 0, p))
    const = lambda shape: pl.BlockSpec(shape, lambda n, p: (0, 0))

    # Activation working set (double-buffered) + headroom, capped at 32 MiB
    # (fits the scoped/physical VMEM on v5e, v6e, and v7x).
    act_bytes = 2 * (2 * C1 + C2) * tile * 4
    vmem_limit = int(min(32 << 20, max(act_bytes + (8 << 20), 16 << 20)))

    out = pl.pallas_call(
        _enhance_kernel,
        out_shape=jax.ShapeDtypeStruct((N, C1, HW), x1.dtype),
        grid_spec=pltpu.PrefetchScalarGridSpec(
            num_scalar_prefetch=0,
            grid=(N, n_pix_tiles),
            in_specs=[
                x1_spec,               # x1 slab (C1, tile)
                x2_spec,               # x2 slab (C2, tile)
                const((C1, C1)),       # fusion conv weight, x1 half
                const((C1, C2)),       # fusion conv weight, x2 half
                const((C1, 1)),        # fusion conv bias
                const((C1, C1)),       # gate conv #1 weight, x1 half
                const((C1, C2)),       # gate conv #1 weight, x2 half
                const((C1, 1)),        # gate conv #1 bias
                const((C1, C1)),       # gate conv #2 weight
                const((C1, 1)),        # gate conv #2 bias
            ],
            out_specs=out_spec,
        ),
        compiler_params=pltpu.CompilerParams(
            dimension_semantics=("parallel", "parallel"),
            vmem_limit_bytes=vmem_limit),
    )(x1r, x2r, wf1, wf2, bf, wg1a, wg1b, bg1, wg2, bg2)

    return out.reshape(N, C1, H, W)


def reference(x1, x2, params):
    """Plain-JAX reference mirroring the PyTorch module (NCHW, 1x1 convs)."""
    N, C1, H, W = x1.shape
    C2 = x2.shape[1]
    cat = jnp.concatenate([x1, x2], axis=1)               # (N, C1+C2, H, W)
    catf = jnp.transpose(cat, (0, 2, 3, 1)).reshape(-1, C1 + C2)
    x1f = jnp.transpose(x1, (0, 2, 3, 1)).reshape(-1, C1)

    wf = params["w_fuse"].reshape(C1, C1 + C2)
    fused = catf @ wf.T + params["b_fuse"]
    wg1 = params["w_gate1"].reshape(C1, C1 + C2)
    h = jnp.maximum(catf @ wg1.T + params["b_gate1"], 0.0)
    wg2 = params["w_gate2"].reshape(C1, C1)
    g = jax.nn.sigmoid(h @ wg2.T + params["b_gate2"])
    out = g * fused + (1.0 - g) * x1f
    return jnp.transpose(out.reshape(N, H, W, C1), (0, 3, 1, 2))


def init_params(key, c1, c2):
    ks = jax.random.split(key, 6)
    s_cat = 1.0 / jnp.sqrt(c1 + c2)
    s_c1 = 1.0 / jnp.sqrt(c1)
    return {
        "w_fuse":  jax.random.uniform(ks[0], (c1, c1 + c2, 1, 1), jnp.float32, -s_cat, s_cat),
        "b_fuse":  jax.random.uniform(ks[1], (c1,), jnp.float32, -s_cat, s_cat),
        "w_gate1": jax.random.uniform(ks[2], (c1, c1 + c2, 1, 1), jnp.float32, -s_cat, s_cat),
        "b_gate1": jax.random.uniform(ks[3], (c1,), jnp.float32, -s_cat, s_cat),
        "w_gate2": jax.random.uniform(ks[4], (c1, c1, 1, 1), jnp.float32, -s_c1, s_c1),
        "b_gate2": jax.random.uniform(ks[5], (c1,), jnp.float32, -s_c1, s_c1),
    }


if __name__ == "__main__":
    key = jax.random.PRNGKey(0)
    k1, k2, kp = jax.random.split(key, 3)

    N, C1, C2, H, W = 2, 4, 4, 16, 16
    x1 = jax.random.normal(k1, (N, C1, H, W), jnp.float32)
    x2 = jax.random.normal(k2, (N, C2, H, W), jnp.float32)
    params = init_params(kp, C1, C2)

    out = feature_enhancement(x1, x2, params)
    out = jax.block_until_ready(out)

    ref = reference(x1, x2, params)
    assert out.shape == (N, C1, H, W)
    assert jnp.allclose(out, ref, atol=1e-5, rtol=1e-5), "mismatch vs reference"

    print("KERNEL_OK")
</pallas_src>

<mosaic_0001>
module attributes {stable_mosaic.version = 11 : i64} {
  func.func @_enhance_kernel(%arg0: i32, %arg1: i32, %arg2: memref<1x4x256xf32, #tpu.memory_space<vmem>>, %arg3: memref<1x4x256xf32, #tpu.memory_space<vmem>>, %arg4: memref<4x4xf32, #tpu.memory_space<vmem>>, %arg5: memref<4x4xf32, #tpu.memory_space<vmem>>, %arg6: memref<4x1xf32, #tpu.memory_space<vmem>>, %arg7: memref<4x4xf32, #tpu.memory_space<vmem>>, %arg8: memref<4x4xf32, #tpu.memory_space<vmem>>, %arg9: memref<4x1xf32, #tpu.memory_space<vmem>>, %arg10: memref<4x4xf32, #tpu.memory_space<vmem>>, %arg11: memref<4x1xf32, #tpu.memory_space<vmem>>, %arg12: memref<1x4x256xf32, #tpu.memory_space<vmem>>) attributes {dimension_semantics = [#tpu.dimension_semantics<parallel>, #tpu.dimension_semantics<parallel>], iteration_bounds = array<i64: 2, 1>, scalar_prefetch = 0 : i64, scratch_operands = 0 : i64, tpu.core_type = #tpu.core_type<tc>, window_params = [{transform_indices = @transform_0, window_bounds = array<i64: 1, 4, 256>}, {transform_indices = @transform_1, window_bounds = array<i64: 1, 4, 256>}, {pipeline_mode = #tpu.pipeline_mode<synchronous>, transform_indices = @transform_2, window_bounds = array<i64: 4, 4>}, {pipeline_mode = #tpu.pipeline_mode<synchronous>, transform_indices = @transform_3, window_bounds = array<i64: 4, 4>}, {pipeline_mode = #tpu.pipeline_mode<synchronous>, transform_indices = @transform_4, window_bounds = array<i64: 4, 1>}, {pipeline_mode = #tpu.pipeline_mode<synchronous>, transform_indices = @transform_5, window_bounds = array<i64: 4, 4>}, {pipeline_mode = #tpu.pipeline_mode<synchronous>, transform_indices = @transform_6, window_bounds = array<i64: 4, 4>}, {pipeline_mode = #tpu.pipeline_mode<synchronous>, transform_indices = @transform_7, window_bounds = array<i64: 4, 1>}, {pipeline_mode = #tpu.pipeline_mode<synchronous>, transform_indices = @transform_8, window_bounds = array<i64: 4, 4>}, {pipeline_mode = #tpu.pipeline_mode<synchronous>, transform_indices = @transform_9, window_bounds = array<i64: 4, 1>}, {transform_indices = @transform_10, window_bounds = array<i64: 1, 4, 256>}]} {
    %c0 = arith.constant 0 : index
    %c0_0 = arith.constant 0 : index
    %c0_1 = arith.constant 0 : index
    %0 = vector.load %arg2[%c0, %c0_0, %c0_1] : memref<1x4x256xf32, #tpu.memory_space<vmem>>, vector<1x4x256xf32>
    %1 = vector.shape_cast %0 : vector<1x4x256xf32> to vector<4x256xf32>
    %c0_2 = arith.constant 0 : index
    %c0_3 = arith.constant 0 : index
    %c0_4 = arith.constant 0 : index
    %2 = vector.load %arg3[%c0_2, %c0_3, %c0_4] : memref<1x4x256xf32, #tpu.memory_space<vmem>>, vector<1x4x256xf32>
    %3 = vector.shape_cast %2 : vector<1x4x256xf32> to vector<4x256xf32>
    %c0_5 = arith.constant 0 : index
    %c0_6 = arith.constant 0 : index
    %4 = vector.load %arg4[%c0_5, %c0_6] : memref<4x4xf32, #tpu.memory_space<vmem>>, vector<4x4xf32>
    %cst = arith.constant dense<0.000000e+00> : vector<4x256xf32>
    %5 = tpu.matmul %4, %1, %cst {dimension_numbers = #tpu.dot_dimension_numbers<[1], [0], [0], [1], [0, 0, 1, 1], [], []>} : vector<4x4xf32>, vector<4x256xf32>, vector<4x256xf32> -> vector<4x256xf32>
    %c0_7 = arith.constant 0 : index
    %c0_8 = arith.constant 0 : index
    %6 = vector.load %arg5[%c0_7, %c0_8] : memref<4x4xf32, #tpu.memory_space<vmem>>, vector<4x4xf32>
    %cst_9 = arith.constant dense<0.000000e+00> : vector<4x256xf32>
    %7 = tpu.matmul %6, %3, %cst_9 {dimension_numbers = #tpu.dot_dimension_numbers<[1], [0], [0], [1], [0, 0, 1, 1], [], []>} : vector<4x4xf32>, vector<4x256xf32>, vector<4x256xf32> -> vector<4x256xf32>
    %8 = arith.addf %5, %7 : vector<4x256xf32>
    %c0_10 = arith.constant 0 : index
    %c0_11 = arith.constant 0 : index
    %9 = vector.load %arg6[%c0_10, %c0_11] : memref<4x1xf32, #tpu.memory_space<vmem>>, vector<4x1xf32>
    %10 = vector.broadcast %9 : vector<4x1xf32> to vector<4x256xf32>
    %11 = arith.addf %8, %10 : vector<4x256xf32>
    %c0_12 = arith.constant 0 : index
    %c0_13 = arith.constant 0 : index
    %12 = vector.load %arg7[%c0_12, %c0_13] : memref<4x4xf32, #tpu.memory_space<vmem>>, vector<4x4xf32>
    %cst_14 = arith.constant dense<0.000000e+00> : vector<4x256xf32>
    %13 = tpu.matmul %12, %1, %cst_14 {dimension_numbers = #tpu.dot_dimension_numbers<[1], [0], [0], [1], [0, 0, 1, 1], [], []>} : vector<4x4xf32>, vector<4x256xf32>, vector<4x256xf32> -> vector<4x256xf32>
    %c0_15 = arith.constant 0 : index
    %c0_16 = arith.constant 0 : index
    %14 = vector.load %arg8[%c0_15, %c0_16] : memref<4x4xf32, #tpu.memory_space<vmem>>, vector<4x4xf32>
    %cst_17 = arith.constant dense<0.000000e+00> : vector<4x256xf32>
    %15 = tpu.matmul %14, %3, %cst_17 {dimension_numbers = #tpu.dot_dimension_numbers<[1], [0], [0], [1], [0, 0, 1, 1], [], []>} : vector<4x4xf32>, vector<4x256xf32>, vector<4x256xf32> -> vector<4x256xf32>
    %16 = arith.addf %13, %15 : vector<4x256xf32>
    %c0_18 = arith.constant 0 : index
    %c0_19 = arith.constant 0 : index
    %17 = vector.load %arg9[%c0_18, %c0_19] : memref<4x1xf32, #tpu.memory_space<vmem>>, vector<4x1xf32>
    %18 = vector.broadcast %17 : vector<4x1xf32> to vector<4x256xf32>
    %19 = arith.addf %16, %18 : vector<4x256xf32>
    %cst_20 = arith.constant 0.000000e+00 : f32
    %20 = vector.broadcast %cst_20 : f32 to vector<4x256xf32>
    %21 = arith.maximumf %19, %20 : vector<4x256xf32>
    %c0_21 = arith.constant 0 : index
    %c0_22 = arith.constant 0 : index
    %22 = vector.load %arg10[%c0_21, %c0_22] : memref<4x4xf32, #tpu.memory_space<vmem>>, vector<4x4xf32>
    %cst_23 = arith.constant dense<0.000000e+00> : vector<4x256xf32>
    %23 = tpu.matmul %22, %21, %cst_23 {dimension_numbers = #tpu.dot_dimension_numbers<[1], [0], [0], [1], [0, 0, 1, 1], [], []>} : vector<4x4xf32>, vector<4x256xf32>, vector<4x256xf32> -> vector<4x256xf32>
    %c0_24 = arith.constant 0 : index
    %c0_25 = arith.constant 0 : index
    %24 = vector.load %arg11[%c0_24, %c0_25] : memref<4x1xf32, #tpu.memory_space<vmem>>, vector<4x1xf32>
    %25 = vector.broadcast %24 : vector<4x1xf32> to vector<4x256xf32>
    %26 = arith.addf %23, %25 : vector<4x256xf32>
    %27 = arith.negf %26 : vector<4x256xf32>
    %28 = math.exp %27 : vector<4x256xf32>
    %cst_26 = arith.constant 1.000000e+00 : f32
    %29 = vector.broadcast %cst_26 : f32 to vector<4x256xf32>
    %30 = arith.addf %29, %28 : vector<4x256xf32>
    %31 = arith.divf %29, %30 : vector<4x256xf32>
    %32 = arith.subf %11, %1 : vector<4x256xf32>
    %33 = arith.mulf %31, %32 : vector<4x256xf32>
    %34 = arith.addf %1, %33 : vector<4x256xf32>
    %c0_27 = arith.constant 0 : index
    %c0_28 = arith.constant 0 : index
    %c0_29 = arith.constant 0 : index
    %35 = vector.load %arg12[%c0_27, %c0_28, %c0_29] : memref<1x4x256xf32, #tpu.memory_space<vmem>>, vector<1x4x256xf32>
    %36 = vector.shape_cast %35 : vector<1x4x256xf32> to vector<4x256xf32>
    %37 = vector.shape_cast %34 : vector<4x256xf32> to vector<1x4x256xf32>
    tpu.vector_store %arg12[%c0_27, %c0_28, %c0_29], %37 {strides = array<i32>} : memref<1x4x256xf32, #tpu.memory_space<vmem>>, vector<1x4x256xf32>,
    return
  }
  func.func @transform_0(%arg0: i32, %arg1: i32) -> (i32, i32, i32) {
    %c0_i32 = arith.constant 0 : i32
    %c0_i32_0 = arith.constant 0 : i32
    return %arg0, %c0_i32, %arg1 : i32, i32, i32
  }
  func.func @transform_1(%arg0: i32, %arg1: i32) -> (i32, i32, i32) {
    %c0_i32 = arith.constant 0 : i32
    %c0_i32_0 = arith.constant 0 : i32
    return %arg0, %c0_i32, %arg1 : i32, i32, i32
  }
  func.func @transform_2(%arg0: i32, %arg1: i32) -> (i32, i32) {
    %c0_i32 = arith.constant 0 : i32
    %c0_i32_0 = arith.constant 0 : i32
    %c0_i32_1 = arith.constant 0 : i32
    return %c0_i32, %c0_i32_0 : i32, i32
  }
  func.func @transform_3(%arg0: i32, %arg1: i32) -> (i32, i32) {
    %c0_i32 = arith.constant 0 : i32
    %c0_i32_0 = arith.constant 0 : i32
    %c0_i32_1 = arith.constant 0 : i32
    return %c0_i32, %c0_i32_0 : i32, i32
  }
  func.func @transform_4(%arg0: i32, %arg1: i32) -> (i32, i32) {
    %c0_i32 = arith.constant 0 : i32
    %c0_i32_0 = arith.constant 0 : i32
    %c0_i32_1 = arith.constant 0 : i32
    return %c0_i32, %c0_i32_0 : i32, i32
  }
  func.func @transform_5(%arg0: i32, %arg1: i32) -> (i32, i32) {
    %c0_i32 = arith.constant 0 : i32
    %c0_i32_0 = arith.constant 0 : i32
    %c0_i32_1 = arith.constant 0 : i32
    return %c0_i32, %c0_i32_0 : i32, i32
  }
  func.func @transform_6(%arg0: i32, %arg1: i32) -> (i32, i32) {
    %c0_i32 = arith.constant 0 : i32
    %c0_i32_0 = arith.constant 0 : i32
    %c0_i32_1 = arith.constant 0 : i32
    return %c0_i32, %c0_i32_0 : i32, i32
  }
  func.func @transform_7(%arg0: i32, %arg1: i32) -> (i32, i32) {
    %c0_i32 = arith.constant 0 : i32
    %c0_i32_0 = arith.constant 0 : i32
    %c0_i32_1 = arith.constant 0 : i32
    return %c0_i32, %c0_i32_0 : i32, i32
  }
  func.func @transform_8(%arg0: i32, %arg1: i32) -> (i32, i32) {
    %c0_i32 = arith.constant 0 : i32
    %c0_i32_0 = arith.constant 0 : i32
    %c0_i32_1 = arith.constant 0 : i32
    return %c0_i32, %c0_i32_0 : i32, i32
  }
  func.func @transform_9(%arg0: i32, %arg1: i32) -> (i32, i32) {
    %c0_i32 = arith.constant 0 : i32
    %c0_i32_0 = arith.constant 0 : i32
    %c0_i32_1 = arith.constant 0 : i32
    return %c0_i32, %c0_i32_0 : i32, i32
  }
  func.func @transform_10(%arg0: i32, %arg1: i32) -> (i32, i32, i32) {
    %c0_i32 = arith.constant 0 : i32
    %c0_i32_0 = arith.constant 0 : i32
    return %arg0, %c0_i32, %arg1 : i32, i32, i32
  }
}

</mosaic_0001>

<bundles_post_ra>
// kernel: feature_enhancement.1
= control target key start
LH: loop header
LB: loop body
LE: loop exit
PB: predicated region body
PF: predicated region fallthrough
CT: control target
= control target key end

     0   :  { %s1140_s13 = smov 0   ;;  %s1142_s14 = smov 0   ;;  %s1228_s0 = inlined_call_operand.vmem [shape: f32[2,4,256], index: 0, kind: input, shape index: {}]   ;;  %s1229_s1 = inlined_call_operand.vmem [shape: f32[2,4,256], index: 1, kind: input, shape index: {}]   ;;  %s1230_s2 = inlined_call_operand.vmem [shape: f32[4,4], index: 2, kind: input, shape index: {}]   ;;  %s1231_s3 = inlined_call_operand.vmem [shape: f32[4,4], index: 3, kind: input, shape index: {}]   ;;  %s1232_s4 = inlined_call_operand.vmem [shape: f32[4,1], index: 4, kind: input, shape index: {}]   ;;  %s1233_s5 = inlined_call_operand.vmem [shape: f32[4,4], index: 5, kind: input, shape index: {}]   ;;  %s1234_s6 = inlined_call_operand.vmem [shape: f32[4,4], index: 6, kind: input, shape index: {}]   ;;  %s1235_s7 = inlined_call_operand.vmem [shape: f32[4,1], index: 7, kind: input, shape index: {}]   ;;  %s1236_s8 = inlined_call_operand.vmem [shape: f32[4,4], index: 8, kind: input, shape index: {}]   ;;  %s1237_s9 = inlined_call_operand.vmem [shape: f32[4,1], index: 9, kind: input, shape index: {}]   ;;  %s1238_s10 = inlined_call_operand.vmem [shape: f32[2,4,256], index: 10, kind: output, shape index: {}]  }
   0x1   :  { %s1144_s15 = smov 0  }
   0x2 LB: > { %s32_s16 = sadd.s32 1, %s1077_s14  ;;  %p988_p0 = scmp.ge.s32.totalorder %s1081_s15, 1  ;;  %s1081_s15 = sphi %s1144_s15, %s20_s15   ;;  %s1077_s14 = sphi %s1142_s14, %s1240_s14   ;;  %s1073_s13 = sphi %s1140_s13, %s1239_s13  }
   0x3   : > { %p34_p1 = scmp.ge.s32.totalorder %s32_s16, 2  ;;  %p350_p2 = scmp.lt.s32.totalorder %s1081_s15, 3 }
   0x5   : > { %s1242_s16 = smov (%p34_p1, %s32_s16), 0  ;;  %p351_p3 = pnand %p988_p0, %p350_p2 }
   0x6   : > { %p406_p4 = scmp.lt.s32.totalorder (!%p351_p3), %s1073_s13, 1  ;;  %v1083_v0 = vmov (!%p351_p3), 0.0   ;;  %v759_v1 = vld [vmem:[%s1235_s7] sm:$0xf] (!%p351_p3)  ;;  %v1084_v2 = vmov (!%p351_p3), 0   ;;  %vm445_vm0 = vcmask (!%p351_p3), 1043456  }
   0x7   : > { %354 = sbr.rel (%p351_p3) target bundleno = 498 (0x1f2), region = 60  ;;  %678 = vmatprep.mubr.f32.mxu1 (!%p351_p3), %v1083_v0  ;;  %514 = vmatprep.mubr.f32.mxu0 (!%p351_p3), %v1083_v0  ;;  %v770_v3 = vld [vmem:[%s1237_s9] sm:$0xf] (!%p351_p3)  ;;  %vm441_vm1 = vcmask (!%p351_p3), 31744  }
   0x8   : > { %1047 = vset.pattern.permute.xlu0 (!%p351_p3), %v1084_v2  ;;  %1048 = vset.pattern.permute.xlu1 (!%p351_p3), %v1084_v2  ;;  %v610_v8 = vld [vmem:[%s1234_s6] sm:$0xf] (!%p351_p3) }
   0x9   : > { %762 = vperm.xlu0 (!%p351_p3), %1047, %v759_v1   ;;  %v438_v9 = vld [vmem:[%s1231_s3] sm:$0xf] (!%p351_p3) }
   0xa   : > { %v609_v10 = vld [vmem:[%s1233_s5] sm:$0xf] (!%p351_p3) }
   0xb   : > { %v437_v11 = vld [vmem:[%s1230_s2] sm:$0xf] (!%p351_p3) }
   0xc   : > { %v601_v12 = vld [vmem:[%s1232_s4] sm:$0xf] (!%p351_p3) }
   0xd   : > { %773 = vperm.xlu0 (!%p351_p3), %1047, %v770_v3   ;;  %604 = vperm.xlu1 (!%p351_p3), %1048, %v601_v12   ;;  %v769_v22 = vld [vmem:[%s1236_s8] sm:$0xf] (!%p351_p3) }
   0xe   : > { %s1244_s13 = smov (!%p406_p4, %s1073_s13), 1 }
   0xf   : > { %s1161_s19 = sshll.u32 %s1244_s13, 3 }
  0x10   : > { %s413_s24 = scalar_lea.vmem %s1228_s0, %s1161_s19  ;;  %s423_s27 = scalar_lea.vmem %s1229_s1, %s1161_s19 }
  0x11   : > { %v1174_v4 = vld [vmem:[%s413_s24] sm:$0xff]  ;;  %s433_s26 = scalar_lea.vmem %s1238_s10, %s1161_s19 }
  0x12   : > { %v436_v5 = vld [vmem:[%s423_s27] sm:$0xff]  ;;  %v522_v7 = vcombine.high %v1174_v4, %v1174_v4 }
  0x13   : > { %v440_v6 = vcombine.high %v436_v5, %v436_v5 }
  0x15   : > { %1001 = vmatprep.subr.msk.mxu1 %vm445_vm0, %v440_v6  ;;  %995 = vmatprep.subr.msk.mxu0 %vm445_vm0, %v440_v6 }
  0x16   : > { %1002 = vmatpush1.msk.msra.mxu1 %vm445_vm0, %v436_v5  ;;  %996 = vmatpush1.msk.msra.mxu0 %vm445_vm0, %v436_v5 }
  0x17   : > { %1003 = vmatmul.mubr.msk.f32.vlgmr.msra.gmra.mrb[0].mxu1 %vm441_vm1, %v610_v8  ;;  %1004 = vmatprep.subr.msk.mxu1 %vm445_vm0, %v522_v7 }
  0x18   : > { %1005 = vmatpush1.msk.msra.mxu1 %vm445_vm0, %v1174_v4  ;;  %752 = vmatprep.mubr.f32.mxu1 %v1083_v0 }
  0x19   : > { %997 = vmatmul.mubr.msk.f32.vlgmr.msra.gmra.mrb[0].mxu0 %vm441_vm1, %v438_v9  ;;  %998 = vmatprep.subr.msk.mxu0 %vm445_vm0, %v522_v7 }
  0x1a   : > { %999 = vmatpush1.msk.msra.mxu0 %vm445_vm0, %v1174_v4  ;;  %594 = vmatprep.mubr.f32.mxu0 %v1083_v0 }
  0x1f   : > { %1006 = vmatmul.mubr.msk.f32.vlgmr.msra.gmra.mrb[0].mxu1 %vm441_vm1, %v609_v10 }
  0x21   : > { %1000 = vmatmul.mubr.msk.f32.vlgmr.msra.gmra.mrb[0].mxu0 %vm441_vm1, %v437_v11 }
  0x22   : > { %849 = vmatprep.mubr.f32.mxu0 %v1083_v0 }
  0x88   : > { %v763_v13 = vpop.permute.xlu0 %762 }
  0x8c   : > { %v774_v23 = vpop.permute.xlu0 %773  ;;  %v605_v34 = vpop.permute.xlu1 %604 }
  0xf2   : > { %v754_v14 = vpop.f32.mrb[0].mxu1 }
  0xf3   : > { %v765_v15 = vadd.f32 %v763_v13, %v754_v14  ;;  %v756_v16 = vpop.f32.mrb[1].mxu1 }
  0xf4   : > { %v766_v17 = vadd.f32 %v763_v13, %v756_v16  ;;  %v596_v18 = vpop.f32.mrb[0].mxu0 }
  0xf5   : > { %v598_v19 = vpop.f32.mrb[1].mxu0  ;;  %v767_v21 = vmax.f32 %v765_v15, 0.0  ;;  %v607_v35 = vadd.f32 %v605_v34, %v596_v18 }
  0xf6   : > { %v768_v20 = vmax.f32 %v766_v17, 0.0  ;;  %v608_v36 = vadd.f32 %v605_v34, %v598_v19 }
  0xf7   : > { %v869_v37 = vsub.f32 %v607_v35, %v1174_v4 }
  0xf8   : > { %1007 = vmatprep.subr.msk.mxu0 %vm445_vm0, %v768_v20  ;;  %v870_v39 = vsub.f32 %v608_v36, %v522_v7 }
  0xf9   : > { %1008 = vmatpush1.msk.msra.mxu0 %vm445_vm0, %v767_v21 }
  0xfa   : > { %1009 = vmatmul.mubr.msk.f32.vlgmr.msra.gmra.mrb[2].mxu0 %vm441_vm1, %v769_v22 }
 0x1cd   : > { %v851_v24 = vpop.f32.mrb[2].mxu0 }
 0x1ce   : > { %v852_v25 = vadd.f32 %v851_v24, %v774_v23  ;;  %v853_v26 = vpop.f32.mrb[3].mxu0 }
 0x1cf   : > { %v854_v27 = vadd.f32 %v853_v26, %v774_v23 }
 0x1d0   : > { %v1010_v28 = vmul.f32 -1.442695, %v852_v25 }
 0x1d1   : > { %v1011_v29 = vmul.f32 -1.442695, %v854_v27 }
 0x1d2   : > { %1051 = vpow2.f32 %v1010_v28 }
 0x1d3   : > { %1053 = vpow2.f32 %v1011_v29 }
 0x1dc   : > { %v1052_v30 = vpop.eup %1051 }
 0x1dd   : > { %v1054_v31 = vpop.eup %1053  ;;  %v862_v32 = vadd.f32 1.0, %v1052_v30 }
 0x1de   : > { %v863_v33 = vadd.f32 1.0, %v1054_v31 }
 0x1df   : > { %1055 = vrcp.f32 %v862_v32 }
 0x1e0   : > { %1057 = vrcp.f32 %v863_v33 }
 0x1e9   : > { %v1056_v38 = vpop.eup %1055 }
 0x1ea   : > { %v1058_v40 = vpop.eup %1057  ;;  %v871_v41 = vmul.f32 %v1056_v38, %v869_v37 }
 0x1eb   : > { %v872_v42 = vmul.f32 %v1058_v40, %v870_v39 }
 0x1ed   : > { %v875_v43 = vcombine.low %v871_v41, %v872_v42 }
 0x1ef   : > { %v877_v44 = vadd.f32 %v875_v43, %v1174_v4 }
 0x1f1   : > { %878 = vst [vmem:[%s433_s26] sm:$0xff] %v877_v44 }
 0x1f2 PF: > { %s20_s15 = sadd.s32 1, %s1081_s15   ;;  %s1239_s13 = smov %s1077_s14 }
 0x1f3   : > { %p17_p5 = scmp.ge.s32.totalorder %s20_s15, 4   ;;  %s1240_s14 = smov %s1242_s16 }
 0x1f5   :  { %19 = sbr.rel (!%p17_p5) target bundleno = 2 (0x2), region = 93 }

</bundles_post_ra>
